<compile_context>
chip_gen: v7x
topology: tpu7x:2x2x1
jax: 0.10.0
libtpu: 0.0.40
codegen_flags: <defaults>
</compile_context>

<pallas_src>
import functools
import math

import jax
import jax.numpy as jnp
from jax.experimental import pallas as pl
from jax.experimental.pallas import tpu as pltpu


# ---------------------------------------------------------------------------
# Static network configuration (mirrors TemporalConvNet.__init__).
# ---------------------------------------------------------------------------
NUM_INPUTS = 4
NUM_CHANNELS = (8, 8, 8)
KERNEL_SIZE = 2
SEQ_LEN = 16
BATCH = 2


def block_configs(num_inputs, num_channels, kernel_size, dilation_size_list=()):
    cfgs = []
    for i, out_ch in enumerate(num_channels):
        dilation = dilation_size_list[i] if dilation_size_list else 2 ** i
        in_ch = num_inputs if i == 0 else num_channels[i - 1]
        if kernel_size * dilation > 672:             # cap from TemporalConvNet
            dilation = int(672 / kernel_size)
        cfgs.append(dict(cin=int(in_ch), cout=int(out_ch), dilation=int(dilation),
                         padding=(kernel_size - 1) * int(dilation)))
    return cfgs


# ---------------------------------------------------------------------------
# One-time parameter packing (host side, outside the jitted call path).
# ---------------------------------------------------------------------------
def pack_params(params, cfgs, kernel_size, seq_len):
    """Pack all per-block weights/biases into two slabs + static metadata."""
    k = kernel_size
    mats, biases, blocks = [], [], []

    def tap_pack(w):            # [cout, cin, k] -> [cout, k*cin] (taps along cols)
        cout, cin, kk = w.shape
        return jnp.transpose(w, (0, 2, 1)).reshape(cout, kk * cin)

    for cfg, prm in zip(cfgs, params):
        cin, cout, d = cfg["cin"], cfg["cout"], cfg["dilation"]
        p = (k - 1) * d
        assert p <= seq_len, "circular padding requires padding <= sequence length"
        blk = dict(cin=cin, cout=cout, dilation=d, w1=len(mats), b1=len(biases))
        mats.append(tap_pack(prm["w1"])); biases.append(prm["b1"])
        blk["w2"] = len(mats); blk["b2"] = len(biases)
        mats.append(tap_pack(prm["w2"])); biases.append(prm["b2"])
        if cin != cout:                                # downsample 1x1 conv
            blk["wd"] = len(mats); blk["bd"] = len(biases)
            mats.append(prm["wd"][:, :, 0]); biases.append(prm["bd"])
        else:
            blk["wd"] = None; blk["bd"] = None
        blocks.append(blk)

    rmax = max(max(m.shape[0] for m in mats), max(b.shape[0] for b in biases))
    cmax = max(m.shape[1] for m in mats)
    wslab = jnp.stack([jnp.pad(m, ((0, rmax - m.shape[0]), (0, cmax - m.shape[1])))
                       for m in mats]).astype(jnp.float32)
    # Biases stored one-per-column so a [cout, 1] slice broadcasts over lanes.
    bslab = jnp.stack([jnp.pad(b, (0, rmax - b.shape[0])) for b in biases],
                      axis=1).astype(jnp.float32)
    return wslab, bslab, tuple(blocks)


# ---------------------------------------------------------------------------
# Pallas kernel: whole TCN, fully VMEM-resident, one launch.
# ---------------------------------------------------------------------------
def _circ_gather(x, off, n):
    """y[..., t] = x[..., (t + off) % n] via static lane slices + concat."""
    off = off % n
    if off == 0:
        return x
    return jnp.concatenate([x[..., off:], x[..., :off]], axis=-1)


def _tcn_kernel(x_ref, w_ref, b_ref, o_ref, *, blocks, kernel_size, seq_len, batch):
    k, L = kernel_size, seq_len
    b_all = b_ref[...]                                        # [Rmax, n_bias]
    for bi in range(batch):                                   # tiny batch: unrolled
        act = x_ref[bi]                                       # [Cin0, L]
        for blk in blocks:
            cin, cout, d = blk["cin"], blk["cout"], blk["dilation"]
            p = (k - 1) * d
            w1 = w_ref[blk["w1"]][:cout, :k * cin]            # [cout, k*cin]
            b1 = b_all[:cout, blk["b1"]:blk["b1"] + 1]        # [cout, 1]
            w2 = w_ref[blk["w2"]][:cout, :k * cout]
            b2 = b_all[:cout, blk["b2"]:blk["b2"] + 1]

            # conv1: circular pad p + dilated conv == length-L circular conv
            # with tap offsets (j*d - p); one matmul over the packed taps.
            taps = [_circ_gather(act, j * d - p, L) for j in range(k)]
            xcat = taps[0] if k == 1 else jnp.concatenate(taps, axis=0)
            a1 = jnp.maximum(
                jnp.dot(w1, xcat, preferred_element_type=jnp.float32) + b1, 0.0)
            # TODO(synk): Dropout omitted (eval-mode identity; no RNG masking).

            # conv2 + center-crop [p:p+L) == length-L circular conv with tap
            # offsets (+j*d) on a1 (conv1's full-length output is L-periodic).
            taps2 = [_circ_gather(a1, j * d, L) for j in range(k)]
            x2 = taps2[0] if k == 1 else jnp.concatenate(taps2, axis=0)
            a2 = jnp.maximum(
                jnp.dot(w2, x2, preferred_element_type=jnp.float32) + b2, 0.0)

            # Residual (1x1 conv when channel counts differ), final ReLU.
            if blk["wd"] is None:
                res = act
            else:
                wd = w_ref[blk["wd"]][:cout, :cin]
                bd = b_all[:cout, blk["bd"]:blk["bd"] + 1]
                res = jnp.dot(wd, act, preferred_element_type=jnp.float32) + bd
            act = jnp.maximum(a2 + res, 0.0)
        o_ref[bi] = act


def tcn_forward(x, wslab, bslab, *, blocks, kernel_size, seq_len, batch, out_channels):
    """Whole-TCN forward as a single fused Pallas kernel (1 launch, 3 input DMAs)."""
    kern = functools.partial(_tcn_kernel, blocks=blocks, kernel_size=kernel_size,
                             seq_len=seq_len, batch=batch)
    vmem = pl.BlockSpec(memory_space=pltpu.MemorySpace.VMEM)
    return pl.pallas_call(
        kern,
        out_shape=jax.ShapeDtypeStruct((batch, out_channels, seq_len), jnp.float32),
        in_specs=[vmem, vmem, vmem],
        out_specs=vmem,
    )(x, wslab, bslab)
    # TODO(synk): for large batch, add grid=(B // TM,) with row-tiled BlockSpecs
    # on x/out and dimension_semantics=("parallel",) so v7x's two TensorCores
    # split the batch; unnecessary at this toy size.


# ---------------------------------------------------------------------------
# Pure-JAX reference (faithful re-implementation of the PyTorch forward).
# ---------------------------------------------------------------------------
def _conv1d_circular(x, w, b, dilation, padding):
    xp = jnp.pad(x, ((0, 0), (0, 0), (padding, padding)), mode="wrap")
    y = jax.lax.conv_general_dilated(
        xp, w, window_strides=(1,), padding="VALID", rhs_dilation=(dilation,),
        dimension_numbers=("NCH", "OIH", "NCH"),
        precision=jax.lax.Precision.HIGHEST)
    return y + b[None, :, None]


def tcn_reference(x, params, cfgs, kernel_size):
    act = x
    for cfg, prm in zip(cfgs, params):
        p = (kernel_size - 1) * cfg["dilation"]
        y1 = jax.nn.relu(_conv1d_circular(act, prm["w1"], prm["b1"], cfg["dilation"], p))
        y2 = jax.nn.relu(_conv1d_circular(y1, prm["w2"], prm["b2"], cfg["dilation"], p))
        L = act.shape[2]
        idx = (y2.shape[2] - L) // 2
        out = y2[:, :, idx:idx + L]
        if "wd" in prm:
            res = jnp.einsum("oc,bcl->bol", prm["wd"][:, :, 0], act,
                             precision=jax.lax.Precision.HIGHEST)
            res = res + prm["bd"][None, :, None]
        else:
            res = act
        act = jax.nn.relu(out + res)
    return act


def make_params(key, cfgs, kernel_size):
    """Random parameters; weight_norm (w = g * v/||v||, dim=0) folded on host."""
    params = []
    for cfg in cfgs:
        cin, cout = cfg["cin"], cfg["cout"]
        key, *ks = jax.random.split(key, 9)

        def wn(kv, kg, shape):
            v = jax.random.normal(kv, shape, jnp.float32)
            g = jax.random.uniform(kg, (shape[0],), jnp.float32, 0.5, 1.5)
            norm = jnp.sqrt(jnp.sum(v * v, axis=tuple(range(1, v.ndim)), keepdims=True))
            return g.reshape((-1,) + (1,) * (v.ndim - 1)) * v / norm

        b1 = 1.0 / math.sqrt(cin * kernel_size)
        b2 = 1.0 / math.sqrt(cout * kernel_size)
        prm = {
            "w1": wn(ks[0], ks[1], (cout, cin, kernel_size)),
            "b1": jax.random.uniform(ks[2], (cout,), jnp.float32, -b1, b1),
            "w2": wn(ks[3], ks[4], (cout, cout, kernel_size)),
            "b2": jax.random.uniform(ks[5], (cout,), jnp.float32, -b2, b2),
        }
        if cin != cout:
            bd = 1.0 / math.sqrt(cin)
            prm["wd"] = 0.3 * jax.random.normal(ks[6], (cout, cin, 1), jnp.float32)
            prm["bd"] = jax.random.uniform(ks[7], (cout,), jnp.float32, -bd, bd)
        params.append(prm)
    return params


if __name__ == "__main__":
    cfgs = block_configs(NUM_INPUTS, NUM_CHANNELS, KERNEL_SIZE)

    key = jax.random.PRNGKey(0)
    kp, kx = jax.random.split(key)
    params = make_params(kp, cfgs, KERNEL_SIZE)
    x = jax.random.normal(kx, (BATCH, NUM_INPUTS, SEQ_LEN), jnp.float32)

    # One-time parameter packing, outside the jitted call path.
    wslab, bslab, blocks = pack_params(params, cfgs, KERNEL_SIZE, SEQ_LEN)

    run = jax.jit(functools.partial(
        tcn_forward, blocks=blocks, kernel_size=KERNEL_SIZE, seq_len=SEQ_LEN,
        batch=BATCH, out_channels=NUM_CHANNELS[-1]))
    out = jax.block_until_ready(run(x, wslab, bslab))

    ref = tcn_reference(x, params, cfgs, KERNEL_SIZE)
    assert out.shape == (BATCH, NUM_CHANNELS[-1], SEQ_LEN)
    max_err = float(jnp.max(jnp.abs(out - ref)))
    assert jnp.allclose(out, ref, atol=1e-4, rtol=1e-4), max_err

    print("KERNEL_OK")
</pallas_src>

<mosaic_0001>
module attributes {stable_mosaic.version = 11 : i64} {
  func.func @_tcn_kernel(%arg0: memref<2x4x16xf32, #tpu.memory_space<vmem>>, %arg1: memref<7x8x16xf32, #tpu.memory_space<vmem>>, %arg2: memref<8x7xf32, #tpu.memory_space<vmem>>, %arg3: memref<2x8x16xf32, #tpu.memory_space<vmem>>) attributes {dimension_semantics = [], scalar_prefetch = 0 : i64, scratch_operands = 0 : i64, tpu.core_type = #tpu.core_type<tc>} {
    %c0 = arith.constant 0 : index
    %c0_0 = arith.constant 0 : index
    %0 = vector.load %arg2[%c0, %c0_0] : memref<8x7xf32, #tpu.memory_space<vmem>>, vector<8x7xf32>
    %c0_1 = arith.constant 0 : index
    %c0_2 = arith.constant 0 : index
    %c0_3 = arith.constant 0 : index
    %1 = vector.load %arg0[%c0_1, %c0_2, %c0_3] : memref<2x4x16xf32, #tpu.memory_space<vmem>>, vector<1x4x16xf32>
    %2 = vector.shape_cast %1 : vector<1x4x16xf32> to vector<4x16xf32>
    %c0_4 = arith.constant 0 : index
    %c0_5 = arith.constant 0 : index
    %c0_6 = arith.constant 0 : index
    %3 = vector.load %arg1[%c0_4, %c0_5, %c0_6] : memref<7x8x16xf32, #tpu.memory_space<vmem>>, vector<1x8x16xf32>
    %4 = vector.shape_cast %3 : vector<1x8x16xf32> to vector<8x16xf32>
    %5 = vector.extract_strided_slice %4 {offsets = [0, 0], sizes = [8, 8], strides = [1, 1]} : vector<8x16xf32> to vector<8x8xf32>
    %6 = vector.extract_strided_slice %0 {offsets = [0, 0], sizes = [8, 1], strides = [1, 1]} : vector<8x7xf32> to vector<8x1xf32>
    %c1 = arith.constant 1 : index
    %c0_7 = arith.constant 0 : index
    %c0_8 = arith.constant 0 : index
    %7 = vector.load %arg1[%c1, %c0_7, %c0_8] : memref<7x8x16xf32, #tpu.memory_space<vmem>>, vector<1x8x16xf32>
    %8 = vector.shape_cast %7 : vector<1x8x16xf32> to vector<8x16xf32>
    %9 = vector.extract_strided_slice %0 {offsets = [0, 1], sizes = [8, 1], strides = [1, 1]} : vector<8x7xf32> to vector<8x1xf32>
    %10 = vector.extract_strided_slice %2 {offsets = [0, 15], sizes = [4, 1], strides = [1, 1]} : vector<4x16xf32> to vector<4x1xf32>
    %11 = vector.extract_strided_slice %2 {offsets = [0, 0], sizes = [4, 15], strides = [1, 1]} : vector<4x16xf32> to vector<4x15xf32>
    %12 = tpu.concatenate %10, %11 in 1 : vector<4x1xf32>, vector<4x15xf32> -> vector<4x16xf32>
    %13 = tpu.concatenate %12, %2 in 0 : vector<4x16xf32>, vector<4x16xf32> -> vector<8x16xf32>
    %cst = arith.constant dense<0.000000e+00> : vector<8x16xf32>
    %14 = tpu.matmul %5, %13, %cst {dimension_numbers = #tpu.dot_dimension_numbers<[1], [0], [0], [1], [0, 0, 1, 1], [], []>} : vector<8x8xf32>, vector<8x16xf32>, vector<8x16xf32> -> vector<8x16xf32>
    %15 = vector.broadcast %6 : vector<8x1xf32> to vector<8x16xf32>
    %16 = arith.addf %14, %15 : vector<8x16xf32>
    %cst_9 = arith.constant 0.000000e+00 : f32
    %17 = vector.broadcast %cst_9 : f32 to vector<8x16xf32>
    %18 = arith.maximumf %16, %17 : vector<8x16xf32>
    %19 = vector.extract_strided_slice %18 {offsets = [0, 1], sizes = [8, 15], strides = [1, 1]} : vector<8x16xf32> to vector<8x15xf32>
    %20 = vector.extract_strided_slice %18 {offsets = [0, 0], sizes = [8, 1], strides = [1, 1]} : vector<8x16xf32> to vector<8x1xf32>
    %21 = tpu.concatenate %19, %20 in 1 : vector<8x15xf32>, vector<8x1xf32> -> vector<8x16xf32>
    %22 = tpu.concatenate %18, %21 in 0 : vector<8x16xf32>, vector<8x16xf32> -> vector<16x16xf32>
    %cst_10 = arith.constant dense<0.000000e+00> : vector<8x16xf32>
    %23 = tpu.matmul %8, %22, %cst_10 {dimension_numbers = #tpu.dot_dimension_numbers<[1], [0], [0], [1], [0, 0, 1, 1], [], []>} : vector<8x16xf32>, vector<16x16xf32>, vector<8x16xf32> -> vector<8x16xf32>
    %24 = vector.broadcast %9 : vector<8x1xf32> to vector<8x16xf32>
    %25 = arith.addf %23, %24 : vector<8x16xf32>
    %cst_11 = arith.constant 0.000000e+00 : f32
    %26 = vector.broadcast %cst_11 : f32 to vector<8x16xf32>
    %27 = arith.maximumf %25, %26 : vector<8x16xf32>
    %c2 = arith.constant 2 : index
    %c0_12 = arith.constant 0 : index
    %c0_13 = arith.constant 0 : index
    %28 = vector.load %arg1[%c2, %c0_12, %c0_13] : memref<7x8x16xf32, #tpu.memory_space<vmem>>, vector<1x8x16xf32>
    %29 = vector.shape_cast %28 : vector<1x8x16xf32> to vector<8x16xf32>
    %30 = vector.extract_strided_slice %29 {offsets = [0, 0], sizes = [8, 4], strides = [1, 1]} : vector<8x16xf32> to vector<8x4xf32>
    %31 = vector.extract_strided_slice %0 {offsets = [0, 2], sizes = [8, 1], strides = [1, 1]} : vector<8x7xf32> to vector<8x1xf32>
    %cst_14 = arith.constant dense<0.000000e+00> : vector<8x16xf32>
    %32 = tpu.matmul %30, %2, %cst_14 {dimension_numbers = #tpu.dot_dimension_numbers<[1], [0], [0], [1], [0, 0, 1, 1], [], []>} : vector<8x4xf32>, vector<4x16xf32>, vector<8x16xf32> -> vector<8x16xf32>
    %33 = vector.broadcast %31 : vector<8x1xf32> to vector<8x16xf32>
    %34 = arith.addf %32, %33 : vector<8x16xf32>
    %35 = arith.addf %27, %34 : vector<8x16xf32>
    %cst_15 = arith.constant 0.000000e+00 : f32
    %36 = vector.broadcast %cst_15 : f32 to vector<8x16xf32>
    %37 = arith.maximumf %35, %36 : vector<8x16xf32>
    %c3 = arith.constant 3 : index
    %c0_16 = arith.constant 0 : index
    %c0_17 = arith.constant 0 : index
    %38 = vector.load %arg1[%c3, %c0_16, %c0_17] : memref<7x8x16xf32, #tpu.memory_space<vmem>>, vector<1x8x16xf32>
    %39 = vector.shape_cast %38 : vector<1x8x16xf32> to vector<8x16xf32>
    %40 = vector.extract_strided_slice %0 {offsets = [0, 3], sizes = [8, 1], strides = [1, 1]} : vector<8x7xf32> to vector<8x1xf32>
    %c4 = arith.constant 4 : index
    %c0_18 = arith.constant 0 : index
    %c0_19 = arith.constant 0 : index
    %41 = vector.load %arg1[%c4, %c0_18, %c0_19] : memref<7x8x16xf32, #tpu.memory_space<vmem>>, vector<1x8x16xf32>
    %42 = vector.shape_cast %41 : vector<1x8x16xf32> to vector<8x16xf32>
    %43 = vector.extract_strided_slice %0 {offsets = [0, 4], sizes = [8, 1], strides = [1, 1]} : vector<8x7xf32> to vector<8x1xf32>
    %44 = vector.extract_strided_slice %37 {offsets = [0, 14], sizes = [8, 2], strides = [1, 1]} : vector<8x16xf32> to vector<8x2xf32>
    %45 = vector.extract_strided_slice %37 {offsets = [0, 0], sizes = [8, 14], strides = [1, 1]} : vector<8x16xf32> to vector<8x14xf32>
    %46 = tpu.concatenate %44, %45 in 1 : vector<8x2xf32>, vector<8x14xf32> -> vector<8x16xf32>
    %47 = tpu.concatenate %46, %37 in 0 : vector<8x16xf32>, vector<8x16xf32> -> vector<16x16xf32>
    %cst_20 = arith.constant dense<0.000000e+00> : vector<8x16xf32>
    %48 = tpu.matmul %39, %47, %cst_20 {dimension_numbers = #tpu.dot_dimension_numbers<[1], [0], [0], [1], [0, 0, 1, 1], [], []>} : vector<8x16xf32>, vector<16x16xf32>, vector<8x16xf32> -> vector<8x16xf32>
    %49 = vector.broadcast %40 : vector<8x1xf32> to vector<8x16xf32>
    %50 = arith.addf %48, %49 : vector<8x16xf32>
    %cst_21 = arith.constant 0.000000e+00 : f32
    %51 = vector.broadcast %cst_21 : f32 to vector<8x16xf32>
    %52 = arith.maximumf %50, %51 : vector<8x16xf32>
    %53 = vector.extract_strided_slice %52 {offsets = [0, 2], sizes = [8, 14], strides = [1, 1]} : vector<8x16xf32> to vector<8x14xf32>
    %54 = vector.extract_strided_slice %52 {offsets = [0, 0], sizes = [8, 2], strides = [1, 1]} : vector<8x16xf32> to vector<8x2xf32>
    %55 = tpu.concatenate %53, %54 in 1 : vector<8x14xf32>, vector<8x2xf32> -> vector<8x16xf32>
    %56 = tpu.concatenate %52, %55 in 0 : vector<8x16xf32>, vector<8x16xf32> -> vector<16x16xf32>
    %cst_22 = arith.constant dense<0.000000e+00> : vector<8x16xf32>
    %57 = tpu.matmul %42, %56, %cst_22 {dimension_numbers = #tpu.dot_dimension_numbers<[1], [0], [0], [1], [0, 0, 1, 1], [], []>} : vector<8x16xf32>, vector<16x16xf32>, vector<8x16xf32> -> vector<8x16xf32>
    %58 = vector.broadcast %43 : vector<8x1xf32> to vector<8x16xf32>
    %59 = arith.addf %57, %58 : vector<8x16xf32>
    %cst_23 = arith.constant 0.000000e+00 : f32
    %60 = vector.broadcast %cst_23 : f32 to vector<8x16xf32>
    %61 = arith.maximumf %59, %60 : vector<8x16xf32>
    %62 = arith.addf %61, %37 : vector<8x16xf32>
    %cst_24 = arith.constant 0.000000e+00 : f32
    %63 = vector.broadcast %cst_24 : f32 to vector<8x16xf32>
    %64 = arith.maximumf %62, %63 : vector<8x16xf32>
    %c5 = arith.constant 5 : index
    %c0_25 = arith.constant 0 : index
    %c0_26 = arith.constant 0 : index
    %65 = vector.load %arg1[%c5, %c0_25, %c0_26] : memref<7x8x16xf32, #tpu.memory_space<vmem>>, vector<1x8x16xf32>
    %66 = vector.shape_cast %65 : vector<1x8x16xf32> to vector<8x16xf32>
    %67 = vector.extract_strided_slice %0 {offsets = [0, 5], sizes = [8, 1], strides = [1, 1]} : vector<8x7xf32> to vector<8x1xf32>
    %c6 = arith.constant 6 : index
    %c0_27 = arith.constant 0 : index
    %c0_28 = arith.constant 0 : index
    %68 = vector.load %arg1[%c6, %c0_27, %c0_28] : memref<7x8x16xf32, #tpu.memory_space<vmem>>, vector<1x8x16xf32>
    %69 = vector.shape_cast %68 : vector<1x8x16xf32> to vector<8x16xf32>
    %70 = vector.extract_strided_slice %0 {offsets = [0, 6], sizes = [8, 1], strides = [1, 1]} : vector<8x7xf32> to vector<8x1xf32>
    %71 = vector.extract_strided_slice %64 {offsets = [0, 12], sizes = [8, 4], strides = [1, 1]} : vector<8x16xf32> to vector<8x4xf32>
    %72 = vector.extract_strided_slice %64 {offsets = [0, 0], sizes = [8, 12], strides = [1, 1]} : vector<8x16xf32> to vector<8x12xf32>
    %73 = tpu.concatenate %71, %72 in 1 : vector<8x4xf32>, vector<8x12xf32> -> vector<8x16xf32>
    %74 = tpu.concatenate %73, %64 in 0 : vector<8x16xf32>, vector<8x16xf32> -> vector<16x16xf32>
    %cst_29 = arith.constant dense<0.000000e+00> : vector<8x16xf32>
    %75 = tpu.matmul %66, %74, %cst_29 {dimension_numbers = #tpu.dot_dimension_numbers<[1], [0], [0], [1], [0, 0, 1, 1], [], []>} : vector<8x16xf32>, vector<16x16xf32>, vector<8x16xf32> -> vector<8x16xf32>
    %76 = vector.broadcast %67 : vector<8x1xf32> to vector<8x16xf32>
    %77 = arith.addf %75, %76 : vector<8x16xf32>
    %cst_30 = arith.constant 0.000000e+00 : f32
    %78 = vector.broadcast %cst_30 : f32 to vector<8x16xf32>
    %79 = arith.maximumf %77, %78 : vector<8x16xf32>
    %80 = vector.extract_strided_slice %79 {offsets = [0, 4], sizes = [8, 12], strides = [1, 1]} : vector<8x16xf32> to vector<8x12xf32>
    %81 = vector.extract_strided_slice %79 {offsets = [0, 0], sizes = [8, 4], strides = [1, 1]} : vector<8x16xf32> to vector<8x4xf32>
    %82 = tpu.concatenate %80, %81 in 1 : vector<8x12xf32>, vector<8x4xf32> -> vector<8x16xf32>
    %83 = tpu.concatenate %79, %82 in 0 : vector<8x16xf32>, vector<8x16xf32> -> vector<16x16xf32>
    %cst_31 = arith.constant dense<0.000000e+00> : vector<8x16xf32>
    %84 = tpu.matmul %69, %83, %cst_31 {dimension_numbers = #tpu.dot_dimension_numbers<[1], [0], [0], [1], [0, 0, 1, 1], [], []>} : vector<8x16xf32>, vector<16x16xf32>, vector<8x16xf32> -> vector<8x16xf32>
    %85 = vector.broadcast %70 : vector<8x1xf32> to vector<8x16xf32>
    %86 = arith.addf %84, %85 : vector<8x16xf32>
    %cst_32 = arith.constant 0.000000e+00 : f32
    %87 = vector.broadcast %cst_32 : f32 to vector<8x16xf32>
    %88 = arith.maximumf %86, %87 : vector<8x16xf32>
    %89 = arith.addf %88, %64 : vector<8x16xf32>
    %cst_33 = arith.constant 0.000000e+00 : f32
    %90 = vector.broadcast %cst_33 : f32 to vector<8x16xf32>
    %91 = arith.maximumf %89, %90 : vector<8x16xf32>
    %c0_34 = arith.constant 0 : index
    %c0_35 = arith.constant 0 : index
    %c0_36 = arith.constant 0 : index
    %92 = vector.load %arg3[%c0_34, %c0_35, %c0_36] : memref<2x8x16xf32, #tpu.memory_space<vmem>>, vector<1x8x16xf32>
    %93 = vector.shape_cast %92 : vector<1x8x16xf32> to vector<8x16xf32>
    %94 = vector.shape_cast %91 : vector<8x16xf32> to vector<1x8x16xf32>
    tpu.vector_store %arg3[%c0_34, %c0_35, %c0_36], %94 {strides = array<i32>} : memref<2x8x16xf32, #tpu.memory_space<vmem>>, vector<1x8x16xf32>,
    %c1_37 = arith.constant 1 : index
    %c0_38 = arith.constant 0 : index
    %c0_39 = arith.constant 0 : index
    %95 = vector.load %arg0[%c1_37, %c0_38, %c0_39] : memref<2x4x16xf32, #tpu.memory_space<vmem>>, vector<1x4x16xf32>
    %96 = vector.shape_cast %95 : vector<1x4x16xf32> to vector<4x16xf32>
    %c0_40 = arith.constant 0 : index
    %c0_41 = arith.constant 0 : index
    %c0_42 = arith.constant 0 : index
    %97 = vector.load %arg1[%c0_40, %c0_41, %c0_42] : memref<7x8x16xf32, #tpu.memory_space<vmem>>, vector<1x8x16xf32>
    %98 = vector.shape_cast %97 : vector<1x8x16xf32> to vector<8x16xf32>
    %99 = vector.extract_strided_slice %98 {offsets = [0, 0], sizes = [8, 8], strides = [1, 1]} : vector<8x16xf32> to vector<8x8xf32>
    %100 = vector.extract_strided_slice %0 {offsets = [0, 0], sizes = [8, 1], strides = [1, 1]} : vector<8x7xf32> to vector<8x1xf32>
    %c1_43 = arith.constant 1 : index
    %c0_44 = arith.constant 0 : index
    %c0_45 = arith.constant 0 : index
    %101 = vector.load %arg1[%c1_43, %c0_44, %c0_45] : memref<7x8x16xf32, #tpu.memory_space<vmem>>, vector<1x8x16xf32>
    %102 = vector.shape_cast %101 : vector<1x8x16xf32> to vector<8x16xf32>
    %103 = vector.extract_strided_slice %0 {offsets = [0, 1], sizes = [8, 1], strides = [1, 1]} : vector<8x7xf32> to vector<8x1xf32>
    %104 = vector.extract_strided_slice %96 {offsets = [0, 15], sizes = [4, 1], strides = [1, 1]} : vector<4x16xf32> to vector<4x1xf32>
    %105 = vector.extract_strided_slice %96 {offsets = [0, 0], sizes = [4, 15], strides = [1, 1]} : vector<4x16xf32> to vector<4x15xf32>
    %106 = tpu.concatenate %104, %105 in 1 : vector<4x1xf32>, vector<4x15xf32> -> vector<4x16xf32>
    %107 = tpu.concatenate %106, %96 in 0 : vector<4x16xf32>, vector<4x16xf32> -> vector<8x16xf32>
    %cst_46 = arith.constant dense<0.000000e+00> : vector<8x16xf32>
    %108 = tpu.matmul %99, %107, %cst_46 {dimension_numbers = #tpu.dot_dimension_numbers<[1], [0], [0], [1], [0, 0, 1, 1], [], []>} : vector<8x8xf32>, vector<8x16xf32>, vector<8x16xf32> -> vector<8x16xf32>
    %109 = vector.broadcast %100 : vector<8x1xf32> to vector<8x16xf32>
    %110 = arith.addf %108, %109 : vector<8x16xf32>
    %cst_47 = arith.constant 0.000000e+00 : f32
    %111 = vector.broadcast %cst_47 : f32 to vector<8x16xf32>
    %112 = arith.maximumf %110, %111 : vector<8x16xf32>
    %113 = vector.extract_strided_slice %112 {offsets = [0, 1], sizes = [8, 15], strides = [1, 1]} : vector<8x16xf32> to vector<8x15xf32>
    %114 = vector.extract_strided_slice %112 {offsets = [0, 0], sizes = [8, 1], strides = [1, 1]} : vector<8x16xf32> to vector<8x1xf32>
    %115 = tpu.concatenate %113, %114 in 1 : vector<8x15xf32>, vector<8x1xf32> -> vector<8x16xf32>
    %116 = tpu.concatenate %112, %115 in 0 : vector<8x16xf32>, vector<8x16xf32> -> vector<16x16xf32>
    %cst_48 = arith.constant dense<0.000000e+00> : vector<8x16xf32>
    %117 = tpu.matmul %102, %116, %cst_48 {dimension_numbers = #tpu.dot_dimension_numbers<[1], [0], [0], [1], [0, 0, 1, 1], [], []>} : vector<8x16xf32>, vector<16x16xf32>, vector<8x16xf32> -> vector<8x16xf32>
    %118 = vector.broadcast %103 : vector<8x1xf32> to vector<8x16xf32>
    %119 = arith.addf %117, %118 : vector<8x16xf32>
    %cst_49 = arith.constant 0.000000e+00 : f32
    %120 = vector.broadcast %cst_49 : f32 to vector<8x16xf32>
    %121 = arith.maximumf %119, %120 : vector<8x16xf32>
    %c2_50 = arith.constant 2 : index
    %c0_51 = arith.constant 0 : index
    %c0_52 = arith.constant 0 : index
    %122 = vector.load %arg1[%c2_50, %c0_51, %c0_52] : memref<7x8x16xf32, #tpu.memory_space<vmem>>, vector<1x8x16xf32>
    %123 = vector.shape_cast %122 : vector<1x8x16xf32> to vector<8x16xf32>
    %124 = vector.extract_strided_slice %123 {offsets = [0, 0], sizes = [8, 4], strides = [1, 1]} : vector<8x16xf32> to vector<8x4xf32>
    %125 = vector.extract_strided_slice %0 {offsets = [0, 2], sizes = [8, 1], strides = [1, 1]} : vector<8x7xf32> to vector<8x1xf32>
    %cst_53 = arith.constant dense<0.000000e+00> : vector<8x16xf32>
    %126 = tpu.matmul %124, %96, %cst_53 {dimension_numbers = #tpu.dot_dimension_numbers<[1], [0], [0], [1], [0, 0, 1, 1], [], []>} : vector<8x4xf32>, vector<4x16xf32>, vector<8x16xf32> -> vector<8x16xf32>
    %127 = vector.broadcast %125 : vector<8x1xf32> to vector<8x16xf32>
    %128 = arith.addf %126, %127 : vector<8x16xf32>
    %129 = arith.addf %121, %128 : vector<8x16xf32>
    %cst_54 = arith.constant 0.000000e+00 : f32
    %130 = vector.broadcast %cst_54 : f32 to vector<8x16xf32>
    %131 = arith.maximumf %129, %130 : vector<8x16xf32>
    %c3_55 = arith.constant 3 : index
    %c0_56 = arith.constant 0 : index
    %c0_57 = arith.constant 0 : index
    %132 = vector.load %arg1[%c3_55, %c0_56, %c0_57] : memref<7x8x16xf32, #tpu.memory_space<vmem>>, vector<1x8x16xf32>
    %133 = vector.shape_cast %132 : vector<1x8x16xf32> to vector<8x16xf32>
    %134 = vector.extract_strided_slice %0 {offsets = [0, 3], sizes = [8, 1], strides = [1, 1]} : vector<8x7xf32> to vector<8x1xf32>
    %c4_58 = arith.constant 4 : index
    %c0_59 = arith.constant 0 : index
    %c0_60 = arith.constant 0 : index
    %135 = vector.load %arg1[%c4_58, %c0_59, %c0_60] : memref<7x8x16xf32, #tpu.memory_space<vmem>>, vector<1x8x16xf32>
    %136 = vector.shape_cast %135 : vector<1x8x16xf32> to vector<8x16xf32>
    %137 = vector.extract_strided_slice %0 {offsets = [0, 4], sizes = [8, 1], strides = [1, 1]} : vector<8x7xf32> to vector<8x1xf32>
    %138 = vector.extract_strided_slice %131 {offsets = [0, 14], sizes = [8, 2], strides = [1, 1]} : vector<8x16xf32> to vector<8x2xf32>
    %139 = vector.extract_strided_slice %131 {offsets = [0, 0], sizes = [8, 14], strides = [1, 1]} : vector<8x16xf32> to vector<8x14xf32>
    %140 = tpu.concatenate %138, %139 in 1 : vector<8x2xf32>, vector<8x14xf32> -> vector<8x16xf32>
    %141 = tpu.concatenate %140, %131 in 0 : vector<8x16xf32>, vector<8x16xf32> -> vector<16x16xf32>
    %cst_61 = arith.constant dense<0.000000e+00> : vector<8x16xf32>
    %142 = tpu.matmul %133, %141, %cst_61 {dimension_numbers = #tpu.dot_dimension_numbers<[1], [0], [0], [1], [0, 0, 1, 1], [], []>} : vector<8x16xf32>, vector<16x16xf32>, vector<8x16xf32> -> vector<8x16xf32>
    %143 = vector.broadcast %134 : vector<8x1xf32> to vector<8x16xf32>
    %144 = arith.addf %142, %143 : vector<8x16xf32>
    %cst_62 = arith.constant 0.000000e+00 : f32
    %145 = vector.broadcast %cst_62 : f32 to vector<8x16xf32>
    %146 = arith.maximumf %144, %145 : vector<8x16xf32>
    %147 = vector.extract_strided_slice %146 {offsets = [0, 2], sizes = [8, 14], strides = [1, 1]} : vector<8x16xf32> to vector<8x14xf32>
    %148 = vector.extract_strided_slice %146 {offsets = [0, 0], sizes = [8, 2], strides = [1, 1]} : vector<8x16xf32> to vector<8x2xf32>
    %149 = tpu.concatenate %147, %148 in 1 : vector<8x14xf32>, vector<8x2xf32> -> vector<8x16xf32>
    %150 = tpu.concatenate %146, %149 in 0 : vector<8x16xf32>, vector<8x16xf32> -> vector<16x16xf32>
    %cst_63 = arith.constant dense<0.000000e+00> : vector<8x16xf32>
    %151 = tpu.matmul %136, %150, %cst_63 {dimension_numbers = #tpu.dot_dimension_numbers<[1], [0], [0], [1], [0, 0, 1, 1], [], []>} : vector<8x16xf32>, vector<16x16xf32>, vector<8x16xf32> -> vector<8x16xf32>
    %152 = vector.broadcast %137 : vector<8x1xf32> to vector<8x16xf32>
    %153 = arith.addf %151, %152 : vector<8x16xf32>
    %cst_64 = arith.constant 0.000000e+00 : f32
    %154 = vector.broadcast %cst_64 : f32 to vector<8x16xf32>
    %155 = arith.maximumf %153, %154 : vector<8x16xf32>
    %156 = arith.addf %155, %131 : vector<8x16xf32>
    %cst_65 = arith.constant 0.000000e+00 : f32
    %157 = vector.broadcast %cst_65 : f32 to vector<8x16xf32>
    %158 = arith.maximumf %156, %157 : vector<8x16xf32>
    %c5_66 = arith.constant 5 : index
    %c0_67 = arith.constant 0 : index
    %c0_68 = arith.constant 0 : index
    %159 = vector.load %arg1[%c5_66, %c0_67, %c0_68] : memref<7x8x16xf32, #tpu.memory_space<vmem>>, vector<1x8x16xf32>
    %160 = vector.shape_cast %159 : vector<1x8x16xf32> to vector<8x16xf32>
    %161 = vector.extract_strided_slice %0 {offsets = [0, 5], sizes = [8, 1], strides = [1, 1]} : vector<8x7xf32> to vector<8x1xf32>
    %c6_69 = arith.constant 6 : index
    %c0_70 = arith.constant 0 : index
    %c0_71 = arith.constant 0 : index
    %162 = vector.load %arg1[%c6_69, %c0_70, %c0_71] : memref<7x8x16xf32, #tpu.memory_space<vmem>>, vector<1x8x16xf32>
    %163 = vector.shape_cast %162 : vector<1x8x16xf32> to vector<8x16xf32>
    %164 = vector.extract_strided_slice %0 {offsets = [0, 6], sizes = [8, 1], strides = [1, 1]} : vector<8x7xf32> to vector<8x1xf32>
    %165 = vector.extract_strided_slice %158 {offsets = [0, 12], sizes = [8, 4], strides = [1, 1]} : vector<8x16xf32> to vector<8x4xf32>
    %166 = vector.extract_strided_slice %158 {offsets = [0, 0], sizes = [8, 12], strides = [1, 1]} : vector<8x16xf32> to vector<8x12xf32>
    %167 = tpu.concatenate %165, %166 in 1 : vector<8x4xf32>, vector<8x12xf32> -> vector<8x16xf32>
    %168 = tpu.concatenate %167, %158 in 0 : vector<8x16xf32>, vector<8x16xf32> -> vector<16x16xf32>
    %cst_72 = arith.constant dense<0.000000e+00> : vector<8x16xf32>
    %169 = tpu.matmul %160, %168, %cst_72 {dimension_numbers = #tpu.dot_dimension_numbers<[1], [0], [0], [1], [0, 0, 1, 1], [], []>} : vector<8x16xf32>, vector<16x16xf32>, vector<8x16xf32> -> vector<8x16xf32>
    %170 = vector.broadcast %161 : vector<8x1xf32> to vector<8x16xf32>
    %171 = arith.addf %169, %170 : vector<8x16xf32>
    %cst_73 = arith.constant 0.000000e+00 : f32
    %172 = vector.broadcast %cst_73 : f32 to vector<8x16xf32>
    %173 = arith.maximumf %171, %172 : vector<8x16xf32>
    %174 = vector.extract_strided_slice %173 {offsets = [0, 4], sizes = [8, 12], strides = [1, 1]} : vector<8x16xf32> to vector<8x12xf32>
    %175 = vector.extract_strided_slice %173 {offsets = [0, 0], sizes = [8, 4], strides = [1, 1]} : vector<8x16xf32> to vector<8x4xf32>
    %176 = tpu.concatenate %174, %175 in 1 : vector<8x12xf32>, vector<8x4xf32> -> vector<8x16xf32>
    %177 = tpu.concatenate %173, %176 in 0 : vector<8x16xf32>, vector<8x16xf32> -> vector<16x16xf32>
    %cst_74 = arith.constant dense<0.000000e+00> : vector<8x16xf32>
    %178 = tpu.matmul %163, %177, %cst_74 {dimension_numbers = #tpu.dot_dimension_numbers<[1], [0], [0], [1], [0, 0, 1, 1], [], []>} : vector<8x16xf32>, vector<16x16xf32>, vector<8x16xf32> -> vector<8x16xf32>
    %179 = vector.broadcast %164 : vector<8x1xf32> to vector<8x16xf32>
    %180 = arith.addf %178, %179 : vector<8x16xf32>
    %cst_75 = arith.constant 0.000000e+00 : f32
    %181 = vector.broadcast %cst_75 : f32 to vector<8x16xf32>
    %182 = arith.maximumf %180, %181 : vector<8x16xf32>
    %183 = arith.addf %182, %158 : vector<8x16xf32>
    %cst_76 = arith.constant 0.000000e+00 : f32
    %184 = vector.broadcast %cst_76 : f32 to vector<8x16xf32>
    %185 = arith.maximumf %183, %184 : vector<8x16xf32>
    %c1_77 = arith.constant 1 : index
    %c0_78 = arith.constant 0 : index
    %c0_79 = arith.constant 0 : index
    %186 = vector.load %arg3[%c1_77, %c0_78, %c0_79] : memref<2x8x16xf32, #tpu.memory_space<vmem>>, vector<1x8x16xf32>
    %187 = vector.shape_cast %186 : vector<1x8x16xf32> to vector<8x16xf32>
    %188 = vector.shape_cast %185 : vector<8x16xf32> to vector<1x8x16xf32>
    tpu.vector_store %arg3[%c1_77, %c0_78, %c0_79], %188 {strides = array<i32>} : memref<2x8x16xf32, #tpu.memory_space<vmem>>, vector<1x8x16xf32>,
    return
  }
}

</mosaic_0001>

<bundles_post_ra>
// kernel: tcn_forward.1
= control target key start
LH: loop header
LB: loop body
LE: loop exit
PB: predicated region body
PF: predicated region fallthrough
CT: control target
= control target key end

     0   :  { %8 = vsyncpa [#allocation3], 0  ;;  %s1865_s0 = inlined_call_operand.hbm [shape: f32[2,4,16], index: 0, kind: input, shape index: {}]   ;;  %s1866_s1 = inlined_call_operand.hbm [shape: f32[7,8,16], index: 1, kind: input, shape index: {}]   ;;  %s1867_s2 = inlined_call_operand.hbm [shape: f32[8,7], index: 2, kind: input, shape index: {}]   ;;  %s1868_s3 = inlined_call_operand.hbm [shape: f32[2,8,16], index: 3, kind: output, shape index: {}]  }
   0x1   :  { %9 = vsyncpa [#allocation6], 0 }
   0x2   :  { %10 = vsyncpa [#allocation4], 0  ;;  %s1593_s12 = smov [#allocation5]   ;;  %s1499_s16 = scalar_lea.hbm %s1866_s1, 896 }
   0x3   :  { %s28_s13 = sshll.u32 %s1593_s12, 4  ;;  %p1500_p0 = scmp.ne.s32.totalorder %s1866_s1, %s1499_s16  ;;  %s29_s13 = int_to_ptr.vmem [resolvable:$true] %s28_s13 }
   0x4   :  { %p1503_p1 = scmp.lt.u32.totalorder %s1499_s16, %s1866_s1 }
   0x6   :  { %p1505_p2 = pnand %p1503_p1, %p1500_p0 }
   0x8   :  { %1508 = shalt.err (!%p1505_p2)
}
   0x9   :  { %s1509_s21 = scalar_lea.vmem %s29_s13, 896  ;;  %p1514_p4 = scmp.lt.s32.totalorder %s29_s13, %s29_s13 }
   0xa   :  { %p1510_p3 = scmp.ne.s32.totalorder %s29_s13, %s1509_s21  ;;  %p1515_p5 = scmp.lt.s32.totalorder %s1509_s21, %s1509_s21 }
   0xc   :  { %p1516_p6 = por %p1515_p5, %p1514_p4 }
   0xe   :  { %p1517_p7 = pnand %p1516_p6, %p1510_p3 }
  0x10   :  { %1520 = shalt.err (!%p1517_p7)
}
  0x11   :  { %s1594_s22 = smov 128   ;;  %s1595_s23 = smov 8  }
  0x12   :  { %34 = dma.hbm_to_vmem [thread:$0]  %s1866_s1, 896, %s29_s13, [#allocation6], %s1594_s22, %s1594_s22, %s1595_s23  }
  0x13   :  { %s1596_s26 = smov [#allocation2]   ;;  %s1521_s30 = scalar_lea.hbm %s1865_s0, 128 }
  0x14   :  { %s16_s27 = sshll.u32 %s1596_s26, 4  ;;  %p1522_p8 = scmp.ne.s32.totalorder %s1865_s0, %s1521_s30  ;;  %s17_s27 = int_to_ptr.vmem [resolvable:$true] %s16_s27 }
  0x15   :  { %p1525_p9 = scmp.lt.u32.totalorder %s1521_s30, %s1865_s0 }
  0x17   :  { %p1527_p10 = pnand %p1525_p9, %p1522_p8 }
  0x19   :  { %1530 = shalt.err (!%p1527_p10)
}
  0x1a   :  { %s1531_s8 = scalar_lea.vmem %s17_s27, 128  ;;  %p1536_p12 = scmp.lt.s32.totalorder %s17_s27, %s17_s27 }
  0x1b   :  { %p1532_p11 = scmp.ne.s32.totalorder %s17_s27, %s1531_s8  ;;  %p1537_p13 = scmp.lt.s32.totalorder %s1531_s8, %s1531_s8 }
  0x1d   :  { %p1538_p0 = por %p1537_p13, %p1536_p12 }
  0x1f   :  { %p1539_p1 = pnand %p1538_p0, %p1532_p11 }
  0x21   :  { %1542 = shalt.err (!%p1539_p1)
}
  0x22   :  { %s1597_s1 = smov 64   ;;  %s1598_s9 = smov 4  }
  0x23   :  { %22 = dma.hbm_to_vmem [thread:$0]  %s1865_s0, 128, %s17_s27, [#allocation3], %s1597_s1, %s1597_s1, %s1598_s9  }
  0x24   :  { %s1599_s12 = smov [#allocation7]   ;;  %s1543_s16 = scalar_lea.hbm %s1867_s2, 128 }
  0x25   :  { %s41_s13 = sshll.u32 %s1599_s12, 4  ;;  %p1544_p2 = scmp.ne.s32.totalorder %s1867_s2, %s1543_s16  ;;  %s42_s13 = int_to_ptr.vmem [resolvable:$true] %s41_s13 }
  0x26   :  { %p1547_p3 = scmp.lt.u32.totalorder %s1543_s16, %s1867_s2 }
  0x28   :  { %p1549_p4 = pnand %p1547_p3, %p1544_p2 }
  0x2a   :  { %1552 = shalt.err (!%p1549_p4)
}
  0x2b   :  { %s1553_s21 = scalar_lea.vmem %s42_s13, 128  ;;  %p1558_p6 = scmp.lt.s32.totalorder %s42_s13, %s42_s13 }
  0x2c   :  { %p1554_p5 = scmp.ne.s32.totalorder %s42_s13, %s1553_s21  ;;  %p1559_p7 = scmp.lt.s32.totalorder %s1553_s21, %s1553_s21 }
  0x2e   :  { %p1560_p8 = por %p1559_p7, %p1558_p6 }
  0x30   :  { %p1561_p9 = pnand %p1560_p8, %p1554_p5 }
  0x32   :  { %1564 = shalt.err (!%p1561_p9)
}
  0x33   :  { %44 = dma.hbm_to_vmem [thread:$0]  %s1867_s2, 128, %s42_s13, [#allocation6]  }
  0x34   :  { %1587 = dma.done.wait [#allocation3], 128  }
  0x35   :  { %1588 = vsyncadd [#allocation3], 4294967168 }
  0x36   :  { %1589 = dma.done.wait [#allocation6], 1024  }
  0x37   :  { %1590 = vsyncadd [#allocation6], 4294966272  ;;  %v1600_v0 = vmov 0.0   ;;  %vm1601_vm0 = vmmov 0   ;;  %v1602_v1 = vmov 0   ;;  %v1687_v3 = vld [vmem:[#allocation7] sm:$0xff] }
  0x38   :  { %1343 = vmatprep.subr.mxu0 %v1600_v0  ;;  %1345 = vmatprep.mubr.msk.f32.mxu0 %vm1601_vm0, %v1600_v0  ;;  %v55_v2 = vld [vmem:[#allocation2] sm:$0xf]  ;;  %s1603_s2 = smov 113   ;;  %s1604_s25 = smov 1   ;;  %vm66_vm1 = vcmask 7168   ;;  %vm70_vm2 = vcmask 1043456  }
  0x39   :  { %1352 = vmatprep.mubr.msk.f32.mxu1 %vm1601_vm0, %v1600_v0  ;;  %1492 = vset.pattern.permute.xlu1 %v1602_v1  ;;  %v68_v5 = vrot.slane %v55_v2, 4  ;;  %v1693_v8 = vld [vmem:[#allocation5] sm:$0xff]  ;;  %vm77_vm3 = vcmask 64512   ;;  %v1605_v10 = vmov 0.0|0.0   ;;  %v1706_v12 = vld [vmem:[#allocation5 + $0x10] sm:$0xff]  ;;  %vm246_vm4 = vcmask 31744  }
  0x3a   :  { %60 = vrot.lane.b32.xlu0 %v55_v2, %s1603_s2  ;;  %74 = vperm.xlu1 %1492, %v1687_v3   ;;  %v1606_v13 = vmov 1   ;;  %v1607_v15 = vmov 2   ;;  %s1608_s26 = smov 15   ;;  %s1609_s27 = smov 127   ;;  %vm159_vm5 = vcmask 121856   ;;  %v1718_v23 = vld [vmem:[#allocation5 + $0x8] sm:$0xff] }
  0x3b   :  { %1433 = vmatprep.subr.bf16.mxu1 %v1605_v10  ;;  %1494 = vset.pattern.permute.xlu0 %v1607_v15  ;;  %vm165_vm6 = vcmask 130048   ;;  %v1610_v35 = vmov 3   ;;  %s1611_s28 = smov 114   ;;  %s1612_s29 = smov 2   ;;  %vm335_vm7 = vcmask 15360   ;;  %v1735_v40 = vld [vmem:[#allocation5 + $0x18] sm:$0xff] }
  0x3c   :  { %v1613_v46 = vmov 4   ;;  %s1614_s30 = smov 126   ;;  %s1615_s4 = smov 14   ;;  %vm422_vm8 = vcmask 113664   ;;  %v1749_v51 = vld [vmem:[#allocation5 + $0x20] sm:$0xff]  ;;  %v1617_v60 = vmov 5  }
  0x3d   :  { %v685_v52 = vld [vmem:[#allocation2 + $0x4] sm:$0xf]  ;;  %s1616_s5 = smov 116   ;;  %s1618_s6 = smov 124   ;;  %vm601_vm9 = vcmask 97280  }
  0x3e   :  { %63 = vrot.lane.b32.xlu0 %v55_v2, %s1604_s25  ;;  %1493 = vset.pattern.permute.xlu1 %v1606_v13  ;;  %v696_v1 = vrot.slane %v685_v52, 4  ;;  %s1619_s7 = smov 12   ;;  %s1621_s8 = smov [#allocation8]  }
  0x3f   :  { %s1276_s1 = sshll.u32 %s1621_s8, 4  ;;  %s1277_s1 = int_to_ptr.vmem [resolvable:$true] %s1276_s1 }
  0x40   :  { %p1570_p11 = scmp.lt.s32.totalorder %s1277_s1, %s1277_s1 }
  0xac   :  { %v61_v4 = vpop.permute.xlu0 %60 }
  0xb0   :  { %v64_v6 = vpop.permute.xlu0 %63 }
  0xb1   :  { %v67_v7 = vsel %vm66_vm1, %v61_v4, %v64_v6 }
  0xb2   :  { %v71_v9 = vsel %vm70_vm2, %v67_v7, %v68_v5  ;;  %v1770_v5 = vld [vmem:[#allocation5 + $0x28] sm:$0xff] }
  0xb3   :  { %1344 = vmatpush3.msra.mxu0 %v71_v9 }
  0xb4   :  { %1346 = vmatmul.mubr.msk.f32.vlgmr.msra.gmra.mrb[0].mxu0 %vm77_vm3, %v1693_v8  ;;  %1355 = vmatprep.subr.mxu0 %v1600_v0 }
  0xb5   :  { %1356 = vmatpush3.msk.msra.mxu0 %vm70_vm2, %v55_v2  ;;  %1357 = vmatprep.mubr.msk.f32.mxu0 %vm1601_vm0, %v1600_v0 }
  0xb6   :  { %1439 = vmatprep.subr.bf16.mxu0 %v1605_v10 }
  0xb8   :  { %1358 = vmatmul.mubr.msk.f32.vlgmr.msra.gmra.mrb[2].mxu0 %vm246_vm4, %v1706_v12 }
  0xb9   :  { %v1704_v11 = vpop.permute.xlu1 %74  ;;  %1371 = vmatprep.mubr.msk.f32.mxu0 %vm1601_vm0, %v1600_v0 }
 0x187   :  { %v147_v14 = vpop.f32.mrb[0].mxu0 }
 0x188   :  { %v148_v16 = vadd.f32 %v147_v14, %v1704_v11  ;;  %v1347_v17 = vpop.f32.mrb[1].mxu0 }
 0x18a   :  { %v151_v18 = vmax.f32 %v148_v16, 0.0 }
 0x18b   :  { %v318_v24 = vpop.f32.mrb[2].mxu0 }
 0x18c   :  { %156 = vrot.lane.b32.xlu0 %v151_v18, %s1608_s26  ;;  %153 = vrot.lane.b32.xlu1 %v151_v18, %s1609_s27  ;;  %v1359_v25 = vpop.f32.mrb[3].mxu0 }
 0x190   :  { %162 = vperm.xlu1 %1493, %v1687_v3   ;;  %243 = vperm.xlu0 %1494, %v1687_v3  }
 0x194   :  { %1495 = vset.pattern.permute.xlu0 %v1610_v35 }
 0x195   :  { %338 = vperm.xlu0 %1495, %v1687_v3  }
 0x199   :  { %1496 = vset.pattern.permute.xlu0 %v1613_v46 }
 0x19a   :  { %425 = vperm.xlu0 %1496, %v1687_v3  }
 0x19e   :  { %689 = vrot.lane.b32.xlu0 %v685_v52, %s1603_s2 }
 0x19f   :  { %1497 = vset.pattern.permute.xlu0 %v1617_v60 }
 0x1a2   :  { %517 = vperm.xlu0 %1497, %v1687_v3  }
 0x1fe   :  { %v157_v19 = vpop.permute.xlu0 %156  ;;  %v154_v20 = vpop.permute.xlu1 %153 }
 0x1ff   :  { %v160_v21 = vsel %vm159_vm5, %v154_v20, %v157_v19 }
 0x200   :  { %v1434_v22 = vpack.c.bf16 %v160_v21, %v151_v18 }
 0x202   :  { %1435 = vmatpush3.bf16.msra.mxu1 %v1434_v22 }
 0x203   :  { %1436 = vmatprep.subr.bf16.mxu1 %v1605_v10 }
 0x205   :  { %1353 = vmatmul.mubr.msk.f32.vlgmr.msra.gmra.mrb[0].mxu1 %vm165_vm6, %v1718_v23 }
 0x206   :  { %1364 = vmatprep.mubr.msk.f32.mxu1 %vm1601_vm0, %v1600_v0 }
 0x20f   :  { %v1725_v26 = vpop.permute.xlu1 %162  ;;  %v1727_v27 = vpop.permute.xlu0 %243 }
 0x210   :  { %v319_v31 = vadd.f32 %v318_v24, %v1727_v27 }
 0x214   :  { %v1742_v41 = vpop.permute.xlu0 %338 }
 0x219   :  { %v1757_v53 = vpop.permute.xlu0 %425 }
 0x21d   :  { %v690_v4 = vpop.permute.xlu0 %689 }
 0x221   :  { %v1790_v13 = vpop.permute.xlu0 %517 }
 0x2d8   :  { %v235_v28 = vpop.f32.mrb[0].mxu1 }
 0x2d9   :  { %v236_v29 = vadd.f32 %v235_v28, %v1725_v26  ;;  %v1354_v30 = vpop.f32.mrb[1].mxu1 }
 0x2da   :  { %v1799_v30 = vld [vmem:[#allocation5 + $0x30] sm:$0xff] }
 0x2db   :  { %v239_v32 = vmax.f32 %v236_v29, 0.0 }
 0x2dd   :  { %v322_v33 = vadd.f32 %v319_v31, %v239_v32 }
 0x2df   :  { %v323_v34 = vmax.f32 %v322_v33, 0.0 }
 0x2e1   :  { %329 = vrot.lane.b32.xlu1 %v323_v34, %s1611_s28 }
 0x2e5   :  { %332 = vrot.lane.b32.xlu1 %v323_v34, %s1612_s29 }
 0x353   :  { %v330_v36 = vpop.permute.xlu1 %329 }
 0x357   :  { %v333_v37 = vpop.permute.xlu1 %332 }
 0x358   :  { %v336_v38 = vsel %vm335_vm7, %v330_v36, %v333_v37 }
 0x359   :  { %v1437_v39 = vpack.c.bf16 %v323_v34, %v336_v38 }
 0x35b   :  { %1438 = vmatpush3.bf16.msra.mxu1 %v1437_v39 }
 0x35c   :  { %1442 = vmatprep.subr.bf16.mxu1 %v1605_v10 }
 0x35e   :  { %1365 = vmatmul.mubr.msk.f32.vlgmr.msra.gmra.mrb[2].mxu1 %vm165_vm6, %v1735_v40 }
 0x35f   :  { %1378 = vmatprep.mubr.msk.f32.mxu1 %vm1601_vm0, %v1600_v0 }
 0x431   :  { %v410_v42 = vpop.f32.mrb[2].mxu1 }
 0x432   :  { %v411_v43 = vadd.f32 %v410_v42, %v1742_v41  ;;  %v1366_v44 = vpop.f32.mrb[3].mxu1 }
 0x434   :  { %v414_v45 = vmax.f32 %v411_v43, 0.0 }
 0x436   :  { %416 = vrot.lane.b32.xlu1 %v414_v45, %s1614_s30 }
 0x43a   :  { %419 = vrot.lane.b32.xlu1 %v414_v45, %s1615_s4 }
 0x4a8   :  { %v417_v47 = vpop.permute.xlu1 %416 }
 0x4ac   :  { %v420_v48 = vpop.permute.xlu1 %419 }
 0x4ad   :  { %v423_v49 = vsel %vm422_vm8, %v417_v47, %v420_v48 }
 0x4ae   :  { %v1440_v50 = vpack.c.bf16 %v423_v49, %v414_v45 }
 0x4b0   :  { %1441 = vmatpush3.bf16.msra.mxu0 %v1440_v50 }
 0x4b1   :  { %1445 = vmatprep.subr.bf16.mxu0 %v1605_v10 }
 0x4b3   :  { %1372 = vmatmul.mubr.msk.f32.vlgmr.msra.gmra.mrb[4].mxu0 %vm165_vm6, %v1749_v51 }
 0x4b4   :  { %1385 = vmatprep.mubr.msk.f32.mxu0 %vm1601_vm0, %v1600_v0 }
 0x586   :  { %v497_v54 = vpop.f32.mrb[4].mxu0 }
 0x587   :  { %v498_v55 = vadd.f32 %v497_v54, %v1757_v53  ;;  %v1373_v56 = vpop.f32.mrb[5].mxu0 }
 0x589   :  { %v501_v57 = vmax.f32 %v498_v55, 0.0 }
 0x58b   :  { %v502_v58 = vadd.f32 %v501_v57, %v323_v34 }
 0x58d   :  { %v1760_v59 = vmax.f32 %v502_v58, 0.0 }
 0x58f   :  { %509 = vrot.lane.b32.xlu1 %v1760_v59, %s1616_s5 }
 0x593   :  { %512 = vrot.lane.b32.xlu1 %v1760_v59, %s1598_s9 }
 0x597   :  { %692 = vrot.lane.b32.xlu1 %v685_v52, %s1604_s25 }
 0x601   :  { %v510_v61 = vpop.permute.xlu1 %509 }
 0x605   :  { %v513_v62 = vpop.permute.xlu1 %512 }
 0x606   :  { %v515_v63 = vsel %vm246_vm4, %v510_v61, %v513_v62 }
 0x607   :  { %v1443_v2 = vpack.c.bf16 %v1760_v59, %v515_v63 }
 0x609   :  { %1444 = vmatpush3.bf16.msra.mxu1 %v1443_v2  ;;  %v693_v6 = vpop.permute.xlu1 %692 }
 0x60a   :  { %v695_v7 = vsel %vm66_vm1, %v690_v4, %v693_v6  ;;  %1388 = vmatprep.subr.mxu1 %v1600_v0 }
 0x60b   :  { %v698_v9 = vsel %vm70_vm2, %v695_v7, %v696_v1 }
 0x60c   :  { %1379 = vmatmul.mubr.msk.f32.vlgmr.msra.gmra.mrb[4].mxu1 %vm165_vm6, %v1770_v5 }
 0x60d   :  { %1389 = vmatpush3.msra.mxu1 %v698_v9  ;;  %1390 = vmatprep.mubr.msk.f32.mxu1 %vm1601_vm0, %v1600_v0 }
 0x60e   :  { %1400 = vmatprep.subr.mxu1 %v1600_v0 }
 0x610   :  { %1391 = vmatmul.mubr.msk.f32.vlgmr.msra.gmra.mrb[6].mxu1 %vm77_vm3, %v1693_v8 }
 0x611   :  { %1401 = vmatpush3.msk.msra.mxu1 %vm70_vm2, %v685_v52  ;;  %1402 = vmatprep.mubr.msk.f32.mxu1 %vm1601_vm0, %v1600_v0 }
 0x612   :  { %1454 = vmatprep.subr.bf16.mxu1 %v1605_v10 }
 0x614   :  { %1403 = vmatmul.mubr.msk.f32.vlgmr.msra.gmra.mrb[8].mxu1 %vm246_vm4, %v1706_v12 }
 0x615   :  { %1416 = vmatprep.mubr.msk.f32.mxu1 %vm1601_vm0, %v1600_v0 }
 0x6df   :  { %v589_v14 = vpop.f32.mrb[4].mxu1 }
 0x6e0   :  { %v590_v15 = vadd.f32 %v589_v14, %v1790_v13  ;;  %v1380_v16 = vpop.f32.mrb[5].mxu1 }
 0x6e2   :  { %v593_v8 = vmax.f32 %v590_v15, 0.0 }
 0x6e3   :  { %v768_v17 = vpop.f32.mrb[6].mxu1 }
 0x6e4   :  { %v769_v18 = vadd.f32 %v768_v17, %v1704_v11  ;;  %595 = vrot.lane.b32.xlu1 %v593_v8, %s1618_s6  ;;  %v1392_v19 = vpop.f32.mrb[7].mxu1 }
 0x6e6   :  { %v772_v20 = vmax.f32 %v769_v18, 0.0 }
 0x6e7   :  { %v927_v21 = vpop.f32.mrb[8].mxu1 }
 0x6e8   :  { %598 = vrot.lane.b32.xlu1 %v593_v8, %s1619_s7  ;;  %774 = vrot.lane.b32.xlu0 %v772_v20, %s1609_s27  ;;  %v1404_v12 = vpop.f32.mrb[9].mxu1  ;;  %v928_v38 = vadd.f32 %v927_v21, %v1727_v27 }
 0x6ec   :  { %777 = vrot.lane.b32.xlu1 %v772_v20, %s1608_s26 }
 0x756   :  { %v596_v22 = vpop.permute.xlu1 %595 }
 0x75a   :  { %v599_v24 = vpop.permute.xlu1 %598  ;;  %v775_v28 = vpop.permute.xlu0 %774 }
 0x75b   :  { %v602_v25 = vsel %vm601_vm9, %v596_v22, %v599_v24 }
 0x75c   :  { %v1446_v11 = vpack.c.bf16 %v602_v25, %v593_v8 }
 0x75e   :  { %1447 = vmatpush3.bf16.msra.mxu0 %v1446_v11  ;;  %v778_v29 = vpop.permute.xlu1 %777 }
 0x75f   :  { %v780_v31 = vsel %vm159_vm5, %v775_v28, %v778_v29  ;;  %1448 = vmatprep.subr.bf16.mxu0 %v1605_v10 }
 0x760   :  { %v1449_v32 = vpack.c.bf16 %v780_v31, %v772_v20 }
 0x761   :  { %1386 = vmatmul.mubr.msk.f32.vlgmr.msra.gmra.mrb[6].mxu0 %vm165_vm6, %v1799_v30 }
 0x762   :  { %1450 = vmatpush3.bf16.msra.mxu0 %v1449_v32  ;;  %1397 = vmatprep.mubr.msk.f32.mxu0 %vm1601_vm0, %v1600_v0 }
 0x763   :  { %1451 = vmatprep.subr.bf16.mxu0 %v1605_v10 }
 0x765   :  { %1398 = vmatmul.mubr.msk.f32.vlgmr.msra.gmra.mrb[8].mxu0 %vm165_vm6, %v1718_v23 }
 0x766   :  { %1409 = vmatprep.mubr.msk.f32.mxu0 %vm1601_vm0, %v1600_v0 }
 0x834   :  { %v1812_v33 = vpop.f32.mrb[6].mxu0 }
 0x835   :  { %v1387_v34 = vpop.f32.mrb[7].mxu0 }
 0x838   :  { %v850_v35 = vpop.f32.mrb[8].mxu0 }
 0x839   :  { %v851_v36 = vadd.f32 %v850_v35, %v1725_v26  ;;  %v1399_v37 = vpop.f32.mrb[9].mxu0 }
 0x83b   :  { %v854_v39 = vmax.f32 %v851_v36, 0.0 }
 0x83d   :  { %v931_v42 = vadd.f32 %v928_v38, %v854_v39 }
 0x83f   :  { %v932_v43 = vmax.f32 %v931_v42, 0.0 }
 0x841   :  { %939 = vrot.lane.b32.xlu1 %v932_v43, %s1612_s29  ;;  %936 = vrot.lane.b32.xlu0 %v932_v43, %s1611_s28 }
 0x8b3   :  { %v940_v23 = vpop.permute.xlu1 %939  ;;  %v937_v44 = vpop.permute.xlu0 %936 }
 0x8b4   :  { %v942_v45 = vsel %vm335_vm7, %v937_v44, %v940_v23 }
 0x8b5   :  { %v1452_v46 = vpack.c.bf16 %v932_v43, %v942_v45 }
 0x8b7   :  { %1453 = vmatpush3.bf16.msra.mxu0 %v1452_v46 }
 0x8b8   :  { %1457 = vmatprep.subr.bf16.mxu0 %v1605_v10 }
 0x8ba   :  { %1410 = vmatmul.mubr.msk.f32.vlgmr.msra.gmra.mrb[10].mxu0 %vm165_vm6, %v1735_v40 }
 0x8bb   :  { %1423 = vmatprep.mubr.msk.f32.mxu0 %vm1601_vm0, %v1600_v0 }
 0x98d   :  { %v1012_v26 = vpop.f32.mrb[10].mxu0 }
 0x98e   :  { %v1013_v27 = vadd.f32 %v1012_v26, %v1742_v41  ;;  %v1411_v47 = vpop.f32.mrb[11].mxu0 }
 0x990   :  { %v1016_v48 = vmax.f32 %v1013_v27, 0.0 }
 0x992   :  { %1021 = vrot.lane.b32.xlu1 %v1016_v48, %s1615_s4  ;;  %1018 = vrot.lane.b32.xlu0 %v1016_v48, %s1614_s30 }
 0xa04   :  { %v1022_v49 = vpop.permute.xlu1 %1021  ;;  %v1019_v50 = vpop.permute.xlu0 %1018 }
 0xa05   :  { %v1024_v52 = vsel %vm422_vm8, %v1019_v50, %v1022_v49 }
 0xa06   :  { %v1455_v54 = vpack.c.bf16 %v1024_v52, %v1016_v48 }
 0xa08   :  { %1456 = vmatpush3.bf16.msra.mxu1 %v1455_v54 }
 0xa09   :  { %1460 = vmatprep.subr.bf16.mxu1 %v1605_v10 }
 0xa0b   :  { %1417 = vmatmul.mubr.msk.f32.vlgmr.msra.gmra.mrb[10].mxu1 %vm165_vm6, %v1749_v51 }
 0xa0c   :  { %1430 = vmatprep.mubr.msk.f32.mxu1 %vm1601_vm0, %v1600_v0  ;;  %v1620_v0 = vmov 6  }
 0xa0d   :  { %1498 = vset.pattern.permute.xlu0 %v1620_v0 }
 0xade   :  { %v1094_v40 = vpop.f32.mrb[10].mxu1 }
 0xadf   :  { %v1095_v41 = vadd.f32 %v1094_v40, %v1757_v53  ;;  %v1418_v55 = vpop.f32.mrb[11].mxu1 }
 0xae1   :  { %v1098_v56 = vmax.f32 %v1095_v41, 0.0 }
 0xae3   :  { %v1099_v57 = vadd.f32 %v1098_v56, %v932_v43 }
 0xae5   :  { %v1100_v58 = vmax.f32 %v1099_v57, 0.0 }
 0xae7   :  { %1107 = vrot.lane.b32.xlu1 %v1100_v58, %s1598_s9  ;;  %1104 = vrot.lane.b32.xlu0 %v1100_v58, %s1616_s5  ;;  %s1565_s9 = scalar_lea.vmem %s1277_s1, 256 }
 0xae8   :  { %p1566_p10 = scmp.ne.s32.totalorder %s1277_s1, %s1565_s9  ;;  %p1571_p12 = scmp.lt.s32.totalorder %s1565_s9, %s1565_s9 }
 0xaea   :  { %p1572_p13 = por %p1571_p12, %p1570_p11 }
 0xaec   :  { %p1573_p0 = pnand %p1572_p13, %p1566_p10 }
 0xb59   :  { %v1108_v60 = vpop.permute.xlu1 %1107  ;;  %v1105_v61 = vpop.permute.xlu0 %1104 }
 0xb5a   :  { %v1110_v10 = vsel %vm246_vm4, %v1105_v61, %v1108_v60 }
 0xb5b   :  { %v1458_v62 = vpack.c.bf16 %v1100_v58, %v1110_v10 }
 0xb5d   :  { %1459 = vmatpush3.bf16.msra.mxu0 %v1458_v62 }
 0xb60   :  { %1424 = vmatmul.mubr.msk.f32.vlgmr.msra.gmra.mrb[12].mxu0 %vm165_vm6, %v1770_v5 }
 0xc33   :  { %v1180_v51 = vpop.f32.mrb[12].mxu0 }
 0xc34   :  { %v1181_v53 = vadd.f32 %v1180_v51, %v1790_v13  ;;  %v1425_v63 = vpop.f32.mrb[13].mxu0 }
 0xc36   :  { %v1184_v1 = vmax.f32 %v1181_v53, 0.0 }
 0xc38   :  { %1189 = vrot.lane.b32.xlu1 %v1184_v1, %s1619_s7  ;;  %1186 = vrot.lane.b32.xlu0 %v1184_v1, %s1618_s6 }
 0xc3c   :  { %604 = vperm.xlu0 %1498, %v1687_v3  }
 0xcaa   :  { %v1190_v2 = vpop.permute.xlu1 %1189  ;;  %v1187_v4 = vpop.permute.xlu0 %1186 }
 0xcab   :  { %v1192_v6 = vsel %vm601_vm9, %v1187_v4, %v1190_v2 }
 0xcac   :  { %v1461_v7 = vpack.c.bf16 %v1192_v6, %v1184_v1 }
 0xcae   :  { %1462 = vmatpush3.bf16.msra.mxu1 %v1461_v7 }
 0xcb1   :  { %1431 = vmatmul.mubr.msk.f32.vlgmr.msra.gmra.mrb[12].mxu1 %vm165_vm6, %v1799_v30 }
 0xcbb   :  { %v605_v5 = vpop.permute.xlu0 %604 }
 0xcbc   :  { %v677_v9 = vadd.f32 %v1812_v33, %v605_v5 }
 0xcbe   :  { %v680_v13 = vmax.f32 %v677_v9, 0.0 }
 0xcc0   :  { %v681_v14 = vadd.f32 %v680_v13, %v1760_v59 }
 0xcc2   :  { %v682_v15 = vmax.f32 %v681_v14, 0.0 }
 0xcc4   :  { %683 = vst.msk [vmem:[#allocation8] sm:$0xff] %vm165_vm6, %v682_v15 }
 0xd84   :  { %v1262_v16 = vpop.f32.mrb[12].mxu1 }
 0xd85   :  { %v1263_v3 = vadd.f32 %v1262_v16, %v605_v5  ;;  %v1432_v8 = vpop.f32.mrb[13].mxu1 }
 0xd87   :  { %v1266_v17 = vmax.f32 %v1263_v3, 0.0 }
 0xd89   :  { %v1267_v18 = vadd.f32 %v1266_v17, %v1100_v58 }
 0xd8b   :  { %v1268_v19 = vmax.f32 %v1267_v18, 0.0 }
 0xd8d   :  { %1270 = vst.msk [vmem:[#allocation8 + $0x8] sm:$0xff] %vm165_vm6, %v1268_v19 }
 0xd8e   :  { %1576 = shalt.err (!%p1573_p0)
}
 0xd8f   :  { %s1577_s12 = scalar_lea.hbm %s1868_s3, 256 }
 0xd90   :  { %p1578_p1 = scmp.ne.s32.totalorder %s1868_s3, %s1577_s12  ;;  %p1581_p2 = scmp.lt.u32.totalorder %s1577_s12, %s1868_s3 }
 0xd92   :  { %p1583_p3 = pnand %p1581_p2, %p1578_p1 }
 0xd94   :  { %1586 = shalt.err (!%p1583_p3)
}
 0xd95   :  { %1282 = dma.vmem_to_hbm [thread:$0]  %s1277_s1, 256, %s1868_s3, [#allocation4], %s1594_s22, %s1594_s22, %s1595_s23  }
 0xd96   :  { %1591 = dma.done.wait [#allocation4], 256  }
 0xd97   :  { %1592 = vsyncadd [#allocation4], 4294967040 }
 0xd98   :  { %1286 = vsyncpa [#allocation3], 1 }
 0xd99   :  { %1287 = vsyncpa [#allocation6], 1 }
 0xd9a   :  { %1288 = vsyncpa [#allocation4], 1 }

</bundles_post_ra>
